<compile_context>
chip_gen: v7x
topology: tpu7x:2x2x1
jax: 0.10.0
libtpu: 0.0.40
codegen_flags: <defaults>
</compile_context>

<pallas_src>
import math
import jax
import jax.numpy as jnp
from jax.experimental import pallas as pl
from jax.experimental.pallas import tpu as pltpu


def _fused_embed_kernel(x_ref, w_ref, o_ref):
    # x_ref: (tm, K) rows of packed [x_prev | x | x_next | x_mark]
    # w_ref: (K, d_pad) packed [W0; W1; W2; Wlin]   (resident across the grid)
    # o_ref: (tm, d_pad)
    o_ref[...] = jnp.dot(
        x_ref[...], w_ref[...], preferred_element_type=jnp.float32
    ).astype(o_ref.dtype)


def data_embedding_wo_pos(x, x_mark, w_conv, w_lin, *, tm=512):
    """x: (B, L, C); x_mark: (B, L, D_inp);
    w_conv: (3, C, d_model)  (PyTorch Conv1d weight (d_model, C, 3) transposed to (k, c, o));
    w_lin:  (D_inp, d_model) (PyTorch Linear weight (d_model, D_inp) transposed).
    Returns (B, L, d_model)."""
    B, L, C = x.shape
    _, _, D_inp = x_mark.shape
    d_model = w_lin.shape[1]
    K = 3 * C + D_inp

    # Per-batch circular neighbours (wrap is within each sequence, so it is done before
    # flattening rows); then one lane-dense activation slab.
    x_prev = jnp.roll(x, 1, axis=1)    # x[(t-1) mod L]
    x_next = jnp.roll(x, -1, axis=1)   # x[(t+1) mod L]
    x_cat = jnp.concatenate([x_prev, x, x_next, x_mark], axis=-1).reshape(B * L, K)

    # One packed weight; lane-pad d_model to a multiple of 128 for unmasked stores.
    w = jnp.concatenate([w_conv[0], w_conv[1], w_conv[2], w_lin], axis=0)  # (K, d_model)
    d_pad = ((d_model + 127) // 128) * 128
    if d_pad != d_model:
        w = jnp.pad(w, ((0, 0), (0, d_pad - d_model)))

    rows = B * L
    tm = min(tm, rows)                 # tm==rows (full dim) when the problem is small
    grid = (pl.cdiv(rows, tm),)

    out = pl.pallas_call(
        _fused_embed_kernel,
        out_shape=jax.ShapeDtypeStruct((rows, d_pad), x.dtype),
        grid_spec=pltpu.PrefetchScalarGridSpec(
            num_scalar_prefetch=0,
            grid=grid,
            in_specs=[
                pl.BlockSpec((tm, K), lambda i: (i, 0)),       # row tile of activations
                pl.BlockSpec((K, d_pad), lambda i: (0, 0)),    # packed weight, resident
            ],
            out_specs=pl.BlockSpec((tm, d_pad), lambda i: (i, 0)),
        ),
        compiler_params=pltpu.CompilerParams(
            dimension_semantics=("parallel",),
        ),
    )(x_cat, w)

    if d_pad != d_model:
        out = out[:, :d_model]
    return out.reshape(B, L, d_model)


def reference(x, x_mark, w_conv, w_lin):
    # Independent reference: explicit circular padding + windowed matmuls + linear.
    B, L, C = x.shape
    x_pad = jnp.concatenate([x[:, -1:, :], x, x[:, :1, :]], axis=1)  # (B, L+2, C)
    conv = sum(
        jnp.einsum("blc,co->blo", x_pad[:, k:k + L, :], w_conv[k]) for k in range(3)
    )
    return conv + jnp.einsum("bld,do->blo", x_mark, w_lin)


if __name__ == "__main__":
    # Small shapes consistent with the module's forward pass.
    B, L = 2, 8
    c_in, d_inp, d_model = 4, 5, 32

    key = jax.random.PRNGKey(0)
    kx, kxm, kwc, kwl = jax.random.split(key, 4)

    x = jax.random.normal(kx, (B, L, c_in), dtype=jnp.float32)
    x_mark = jax.random.normal(kxm, (B, L, d_inp), dtype=jnp.float32)

    # Conv1d weight: kaiming_normal_(fan_in, leaky_relu) on shape (d_model, c_in, 3).
    fan_in = c_in * 3
    gain = math.sqrt(2.0 / (1.0 + 0.01 ** 2))
    std = gain / math.sqrt(fan_in)
    w_conv_pt = std * jax.random.normal(kwc, (d_model, c_in, 3), dtype=jnp.float32)
    w_conv = jnp.transpose(w_conv_pt, (2, 1, 0))  # (3, c_in, d_model)

    # Linear weight: PyTorch default U(-1/sqrt(d_inp), 1/sqrt(d_inp)), shape (d_model, d_inp).
    bound = 1.0 / math.sqrt(d_inp)
    w_lin_pt = jax.random.uniform(kwl, (d_model, d_inp), jnp.float32, -bound, bound)
    w_lin = w_lin_pt.T  # (d_inp, d_model)

    out = data_embedding_wo_pos(x, x_mark, w_conv, w_lin)
    out = jax.block_until_ready(out)

    ref = reference(x, x_mark, w_conv, w_lin)
    assert out.shape == (B, L, d_model)
    assert jnp.allclose(out, ref, atol=1e-4, rtol=1e-4), "mismatch vs reference"

    print("KERNEL_OK")
</pallas_src>

<mosaic_0001>
module attributes {stable_mosaic.version = 11 : i64} {
  func.func @_fused_embed_kernel(%arg0: i32, %arg1: memref<16x17xf32, #tpu.memory_space<vmem>>, %arg2: memref<17x128xf32, #tpu.memory_space<vmem>>, %arg3: memref<16x128xf32, #tpu.memory_space<vmem>>) attributes {dimension_semantics = [#tpu.dimension_semantics<parallel>], iteration_bounds = array<i64: 1>, scalar_prefetch = 0 : i64, scratch_operands = 0 : i64, tpu.core_type = #tpu.core_type<tc>, window_params = [{transform_indices = @transform_0, window_bounds = array<i64: 16, 17>}, {pipeline_mode = #tpu.pipeline_mode<synchronous>, transform_indices = @transform_1, window_bounds = array<i64: 17, 128>}, {transform_indices = @transform_2, window_bounds = array<i64: 16, 128>}]} {
    %c0 = arith.constant 0 : index
    %c0_0 = arith.constant 0 : index
    %0 = vector.load %arg1[%c0, %c0_0] : memref<16x17xf32, #tpu.memory_space<vmem>>, vector<16x17xf32>
    %c0_1 = arith.constant 0 : index
    %c0_2 = arith.constant 0 : index
    %1 = vector.load %arg2[%c0_1, %c0_2] : memref<17x128xf32, #tpu.memory_space<vmem>>, vector<17x128xf32>
    %cst = arith.constant dense<0.000000e+00> : vector<16x128xf32>
    %2 = tpu.matmul %0, %1, %cst {dimension_numbers = #tpu.dot_dimension_numbers<[1], [0], [0], [1], [0, 0, 1, 1], [], []>} : vector<16x17xf32>, vector<17x128xf32>, vector<16x128xf32> -> vector<16x128xf32>
    %c0_3 = arith.constant 0 : index
    %c0_4 = arith.constant 0 : index
    %3 = vector.load %arg3[%c0_3, %c0_4] : memref<16x128xf32, #tpu.memory_space<vmem>>, vector<16x128xf32>
    tpu.vector_store %arg3[%c0_3, %c0_4], %2 {strides = array<i32>} : memref<16x128xf32, #tpu.memory_space<vmem>>, vector<16x128xf32>,
    return
  }
  func.func @transform_0(%arg0: i32) -> (i32, i32) {
    %c0_i32 = arith.constant 0 : i32
    %c0_i32_0 = arith.constant 0 : i32
    return %arg0, %c0_i32 : i32, i32
  }
  func.func @transform_1(%arg0: i32) -> (i32, i32) {
    %c0_i32 = arith.constant 0 : i32
    %c0_i32_0 = arith.constant 0 : i32
    %c0_i32_1 = arith.constant 0 : i32
    return %c0_i32, %c0_i32_0 : i32, i32
  }
  func.func @transform_2(%arg0: i32) -> (i32, i32) {
    %c0_i32 = arith.constant 0 : i32
    %c0_i32_0 = arith.constant 0 : i32
    return %arg0, %c0_i32 : i32, i32
  }
}

</mosaic_0001>

<bundles_post_ra>
// kernel: tpu_custom_call.1
= control target key start
LH: loop header
LB: loop body
LE: loop exit
PB: predicated region body
PF: predicated region fallthrough
CT: control target
= control target key end

     0   :  { %7 = vsyncpa [#allocation3], 0  ;;  %s314_s0 = inlined_call_operand.hbm [shape: f32[16,17], index: 0, kind: input, shape index: {}]   ;;  %s315_s1 = inlined_call_operand.hbm [shape: f32[17,128], index: 1, kind: input, shape index: {}]   ;;  %s316_s2 = inlined_call_operand.hbm [shape: f32[16,128], index: 2, kind: output, shape index: {}]  }
   0x1   :  { %8 = vsyncpa [#allocation6], 0 }
   0x2   :  { %9 = vsyncpa [#allocation4], 0  ;;  %s249_s9 = smov [#allocation2]   ;;  %s177_s13 = scalar_lea.hbm %s314_s0, 256 }
   0x3   :  { %s15_s10 = sshll.u32 %s249_s9, 4  ;;  %p178_p0 = scmp.ne.s32.totalorder %s314_s0, %s177_s13  ;;  %s16_s10 = int_to_ptr.vmem [resolvable:$true] %s15_s10 }
   0x4   :  { %p181_p1 = scmp.lt.u32.totalorder %s177_s13, %s314_s0 }
   0x6   :  { %p183_p2 = pnand %p181_p1, %p178_p0 }
   0x8   :  { %186 = shalt.err (!%p183_p2)
}
   0x9   :  { %s187_s18 = scalar_lea.vmem %s16_s10, 256  ;;  %p192_p4 = scmp.lt.s32.totalorder %s16_s10, %s16_s10 }
   0xa   :  { %p188_p3 = scmp.ne.s32.totalorder %s16_s10, %s187_s18  ;;  %p193_p5 = scmp.lt.s32.totalorder %s187_s18, %s187_s18 }
   0xc   :  { %p194_p6 = por %p193_p5, %p192_p4 }
   0xe   :  { %p195_p7 = pnand %p194_p6, %p188_p3 }
  0x10   :  { %198 = shalt.err (!%p195_p7)
}
  0x11   :  { %s250_s19 = smov 128   ;;  %s251_s20 = smov 8  }
  0x12   :  { %21 = dma.hbm_to_vmem [thread:$0]  %s314_s0, 256, %s16_s10, [#allocation3], %s250_s19, %s250_s19, %s251_s20  }
  0x13   :  { %s252_s23 = smov [#allocation5]   ;;  %s199_s27 = scalar_lea.hbm %s315_s1, 384 }
  0x14   :  { %s27_s24 = sshll.u32 %s252_s23, 4  ;;  %p200_p8 = scmp.ne.s32.totalorder %s315_s1, %s199_s27  ;;  %s28_s24 = int_to_ptr.vmem [resolvable:$true] %s27_s24 }
  0x15   :  { %p203_p9 = scmp.lt.u32.totalorder %s199_s27, %s315_s1 }
  0x17   :  { %p205_p10 = pnand %p203_p9, %p200_p8 }
  0x19   :  { %208 = shalt.err (!%p205_p10)
}
  0x1a   :  { %s209_s4 = scalar_lea.vmem %s28_s24, 384  ;;  %p214_p12 = scmp.lt.s32.totalorder %s28_s24, %s28_s24 }
  0x1b   :  { %p210_p11 = scmp.ne.s32.totalorder %s28_s24, %s209_s4  ;;  %p215_p13 = scmp.lt.s32.totalorder %s209_s4, %s209_s4 }
  0x1d   :  { %p216_p0 = por %p215_p13, %p214_p12 }
  0x1f   :  { %p217_p1 = pnand %p216_p0, %p210_p11 }
  0x21   :  { %220 = shalt.err (!%p217_p1)
}
  0x22   :  { %33 = dma.hbm_to_vmem [thread:$0]  %s315_s1, 384, %s28_s24, [#allocation6], %s250_s19, %s250_s19, %s251_s20  }
  0x23   :  { %243 = dma.done.wait [#allocation3], 256  }
  0x24   :  { %244 = vsyncadd [#allocation3], 4294967040 }
  0x25   :  { %245 = dma.done.wait [#allocation6], 384  }
  0x26   :  { %246 = vsyncadd [#allocation6], 4294966912  ;;  %vm45_vm0 = vcmask 138240   ;;  %v42_v0 = vld [vmem:[#allocation5] sm:$0xff]  ;;  %v43_v1 = vld [vmem:[#allocation5 + $0x8] sm:$0xff]  ;;  %vm52_vm1 = vcmask 1040384  }
  0x27   :  { %v168_v2 = vpack.c.bf16 %v43_v1, %v42_v0  ;;  %v40_v3 = vld [vmem:[#allocation2] sm:$0xff]  ;;  %v41_v5 = vld [vmem:[#allocation2 + $0x8] sm:$0xff]  ;;  %s253_s6 = smov [#allocation7]  }
  0x28   :  { %v44_v4 = vld [vmem:[#allocation5 + $0x10] sm:$0x1]  ;;  %165 = vmatprep.mubr.msk.f32.mxu0 %vm45_vm0, %v40_v3  ;;  %s138_s1 = sshll.u32 %s253_s6, 4  ;;  %s139_s1 = int_to_ptr.vmem [resolvable:$true] %s138_s1 }
  0x29   :  { %169 = vmatprep.subr.bf16.mxu0 %v168_v2  ;;  %s221_s7 = scalar_lea.vmem %s139_s1, 256  ;;  %p226_p3 = scmp.lt.s32.totalorder %s139_s1, %s139_s1 }
  0x2a   :  { %171 = vmatpush3.bf16.msra.mxu0 %v168_v2  ;;  %p222_p2 = scmp.ne.s32.totalorder %s139_s1, %s221_s7  ;;  %p227_p4 = scmp.lt.s32.totalorder %s221_s7, %s221_s7 }
  0x2b   :  { %163 = vmatprep.subr.msk.mxu0 %vm52_vm1, %v44_v4 }
  0x2c   :  { %p228_p5 = por %p227_p4, %p226_p3 }
  0x2e   :  { %164 = vmatpush3.msk.msra.mxu0 %vm52_vm1, %v44_v4  ;;  %p229_p6 = pnand %p228_p5, %p222_p2 }
  0x2f   :  { %166 = vmatmul.mubr.msk.f32.vlgmr.msra.gmra.mrb[0].mxu0 %vm45_vm0, %v41_v5 }
 0x102   :  { %v167_v6 = vpop.f32.mrb[0].mxu0 }
 0x103   :  { %132 = vst [vmem:[#allocation7 + $0x8] sm:$0xff] %v167_v6  ;;  %v122_v7 = vpop.f32.mrb[1].mxu0 }
 0x104   :  { %131 = vst [vmem:[#allocation7] sm:$0xff] %v122_v7 }
 0x105   :  { %232 = shalt.err (!%p229_p6)
}
 0x106   :  { %s233_s10 = scalar_lea.hbm %s316_s2, 256 }
 0x107   :  { %p234_p7 = scmp.ne.s32.totalorder %s316_s2, %s233_s10  ;;  %p237_p8 = scmp.lt.u32.totalorder %s233_s10, %s316_s2 }
 0x109   :  { %p239_p9 = pnand %p237_p8, %p234_p7 }
 0x10b   :  { %242 = shalt.err (!%p239_p9)
}
 0x10c   :  { %144 = dma.vmem_to_hbm [thread:$0]  %s139_s1, 256, %s316_s2, [#allocation4], %s250_s19, %s250_s19, %s251_s20  }
 0x10d   :  { %247 = dma.done.wait [#allocation4], 256  }
 0x10e   :  { %248 = vsyncadd [#allocation4], 4294967040 }
 0x10f   :  { %148 = vsyncpa [#allocation3], 1 }
 0x110   :  { %149 = vsyncpa [#allocation6], 1 }
 0x111   :  { %150 = vsyncpa [#allocation4], 1 }

</bundles_post_ra>
